<compile_context>
chip_gen: v5e
topology: v5e:2x2
jax: 0.10.0
libtpu: 0.0.40
codegen_flags: <defaults>
</compile_context>

<pallas_src>
import functools

import numpy as np
import jax
import jax.numpy as jnp
from jax.experimental import pallas as pl
from jax.experimental.pallas import tpu as pltpu

INPUT_LAYER = "input"


# ----------------------------------------------------------------------------
# Graph machinery (faithful port of the PyTorch GraphModule plumbing; host-side)
# ----------------------------------------------------------------------------
def _canonicalize_input(op):
    if isinstance(op, tuple):
        op, inpts = op
        if isinstance(inpts, (str, int)):
            return op, [inpts]
        elif isinstance(inpts, list):
            return op, list(inpts)
        else:
            raise ValueError(f"Cannot parse (op, inputs): {(op, inpts)}")
    return op, [-1]


def _normpath(path, sep="/"):
    parts = []
    for p in path.split(sep):
        if p == "..":
            parts.pop()
        elif p.startswith(sep):
            parts = [p]
        else:
            parts.append(p)
    return sep.join(parts)


def _iter_flatten_dict(d, join_op, prefix=()):
    for k, v in d.items():
        if isinstance(v, dict):
            yield from _iter_flatten_dict(v, join_op, prefix + (k,))
        else:
            yield join_op(prefix + (k,)), v


def model2graph(model, sep="/"):
    flattened = [(path, _canonicalize_input(op))
                 for path, op in _iter_flatten_dict(model, join_op=sep.join)]
    graph = {}
    for idx, (path, (op, inpts)) in enumerate(flattened):
        if op is not None:
            for i, inpt in enumerate(inpts):
                if isinstance(inpt, int):
                    inpts[i] = flattened[idx + inpt][0]
                elif isinstance(inpt, str) and inpt not in graph:
                    inpts[i] = _normpath(sep.join([path, "..", inpt]), sep=sep)
                assert inpts[i] in graph, f"bad input {inpts[i]} for {path}"
        if path in graph:
            raise ValueError(f"Duplicate path {path}")
        graph[path] = (op, inpts)
    return graph


class GraphModule:
    """JAX re-implementation of the PyTorch GraphModule forward semantics."""

    def __init__(self, architecture, inputs=None, outputs=None, default_output=None):
        self.graph = model2graph(architecture)
        self.inputs = list(inputs) if inputs is not None else [INPUT_LAYER]
        self.outputs = list(outputs) if outputs is not None else list(architecture.keys())[-1:]
        self.default_output = default_output if default_output is not None else self.outputs[-1]

    def __call__(self, initial_input):
        acts = {self.inputs[0]: initial_input}
        for name, (op, layer_inputs) in self.graph.items():
            if name in acts:
                continue
            if all(i in acts for i in layer_inputs):
                if op is None:
                    assert len(layer_inputs) == 1
                    acts[name] = acts[layer_inputs[0]]
                else:
                    acts[name] = op(*(acts[i] for i in layer_inputs))
        return acts[self.default_output]


# ----------------------------------------------------------------------------
# The single fused Pallas kernel: conv1+relu -> conv2+relu+residual -> GAP -> FC
# ----------------------------------------------------------------------------
def _full_spec(shape):
    """Whole-array VMEM block (block dims equal full array dims -> no (8,128) issue)."""
    return pl.BlockSpec(tuple(shape), lambda i: (0,) * len(shape))


def _fused_forward_kernel(x_ref, mtop_ref, mbot_ref, m1_ref, b1_ref, m2_ref, b2_ref,
                          wf_ref, bf_ref, o_ref, *, n, h, n_pad):
    """Whole forward pass on lane-dense 2D views; activations never leave VMEM.

    x_ref   : (N*H, W*Cin)        f32 input view
    mtop/mbot: (N*H, 1)           f32 0/1 masks for the off-center h taps
    m1_ref  : (3*W*Cin, W*Cmid)   bf16 banded conv1 weights (3 taps stacked along K)
    m2_ref  : (3*W*Cmid, W*Cmid)  bf16 banded conv2 weights
    b1/b2   : (1, W*Cmid)         f32 biases tiled along w
    wf_ref  : (W*Cmid, 128)       bf16 w-tiled FC weight, 1/(H*W) folded in, class-padded
    bf_ref  : (1, 128)            f32 FC bias, class-padded
    o_ref   : (N_pad, 128)        f32 lane-dense logits tile
    """
    nh = n * h
    mask_top = mtop_ref[...]   # zero on each image's first row (tap reads row h-1)
    mask_bot = mbot_ref[...]   # zero on each image's last row  (tap reads row h+1)

    def conv3x3(x_f32, m_cat_ref):
        # h-shift via sublane rolls (XLU slot) + boundary masks (VPU slot, f32); the
        # w-shift and channel mix are folded into the banded M_cat, so the whole conv
        # is ONE long-K MXU dot with bf16 operands / f32 accumulation.
        taps = [
            pltpu.roll(x_f32, shift=1, axis=0) * mask_top,        # kh = 0: input row h-1
            x_f32,                                                # kh = 1: input row h
            pltpu.roll(x_f32, shift=nh - 1, axis=0) * mask_bot,   # kh = 2: input row h+1
        ]
        x_cat = jnp.concatenate(taps, axis=1).astype(jnp.bfloat16)
        return jnp.dot(x_cat, m_cat_ref[...], preferred_element_type=jnp.float32)

    x = x_ref[...]                                                    # (N*H, W*Cin) f32
    h1 = jnp.maximum(conv3x3(x, m1_ref) + b1_ref[...], 0.0)          # block1 (f32 epilogue)
    h2 = jnp.maximum(conv3x3(h1, m2_ref) + b2_ref[...], 0.0) + h1    # block2 + residual

    # Global-average-pool: sum over h as an in-register cross-sublane reduction; the
    # sum over w and the 1/(H*W) scale are folded into wf_ref.  The batch is padded to
    # a full (8, 128) lane-dense output tile (sliced back to (N, 10) in the wrapper).
    hsum = jnp.sum(h2.reshape(n, h, h2.shape[-1]), axis=1)            # (N, W*Cmid) f32
    if n_pad > n:
        hsum = jnp.concatenate(
            [hsum, jnp.zeros((n_pad - n, hsum.shape[-1]), jnp.float32)], axis=0)
    o_ref[...] = jnp.dot(hsum.astype(jnp.bfloat16), wf_ref[...],
                         preferred_element_type=jnp.float32) + bf_ref[...]


def _conv_as_mcat(w_oihw, w):
    """Host-side: fold the 3x3 conv's w-shift + channel mix into a banded matrix per
    h-tap and stack the three taps along K, so  conv(x)|tap-sum = x_cat @ M_cat  with
    x_cat = [roll(x,+1)*mask_top, x, roll(x,-1)*mask_bot] on the (N*H, W*C) layout."""
    w_hwio = np.transpose(np.asarray(w_oihw, np.float32), (2, 3, 1, 0))   # (3,3,Cin,Cout)
    mats = [sum(np.kron(np.eye(w, k=1 - dw, dtype=np.float32), w_hwio[dh, dw])
                for dw in range(3)) for dh in range(3)]
    m_cat = np.concatenate(mats, axis=0)                                  # (3*W*Cin, W*Cout)
    return jnp.asarray(m_cat).astype(jnp.bfloat16)


class FusedResConvNet:
    """block1 + block2(+residual) + AdaptiveAvgPool2d(1) + Flatten + Linear as ONE
    fused Pallas kernel (graph op).  All parameters preprocessed once, host-side."""

    def __init__(self, w1, b1, w2, b2, wf, bf, *, n, h, w):
        cmid = int(w1.shape[0])
        ncls = int(wf.shape[0])
        self.n, self.h, self.w = n, h, w
        self.ncls = ncls
        self.ncls_pad = 128                      # lane-dense logits tile
        self.n_pad = max(8, n)                   # sublane-aligned logits tile

        self.m1 = _conv_as_mcat(w1, w)           # (3*W*Cin,  W*Cmid) bf16
        self.m2 = _conv_as_mcat(w2, w)           # (3*W*Cmid, W*Cmid) bf16
        self.b1row = jnp.tile(jnp.asarray(b1, jnp.float32), w).reshape(1, w * cmid)
        self.b2row = jnp.tile(jnp.asarray(b2, jnp.float32), w).reshape(1, w * cmid)

        # GAP sum-over-w + 1/(H*W) folded into the w-tiled FC weight; classes padded
        # to 128 so the output tile is lane-dense.
        wf_t = np.asarray(wf, np.float32).T / np.float32(h * w)          # (Cmid, ncls)
        wf_pad = np.zeros((w * cmid, self.ncls_pad), np.float32)
        wf_pad[:, :ncls] = np.tile(wf_t, (w, 1))
        self.wf_pad = jnp.asarray(wf_pad).astype(jnp.bfloat16)
        bf_pad = np.zeros((1, self.ncls_pad), np.float32)
        bf_pad[0, :ncls] = np.asarray(bf, np.float32)
        self.bf_pad = jnp.asarray(bf_pad)

        # 0/1 boundary masks for the off-center h taps (SAME padding + no bleed
        # between images when the sublane roll wraps across an image boundary).
        hh = np.arange(n * h) % h
        self.mask_top = jnp.asarray((hh != 0).astype(np.float32).reshape(n * h, 1))
        self.mask_bot = jnp.asarray((hh != h - 1).astype(np.float32).reshape(n * h, 1))

    def __call__(self, x_nhwc):
        nn_, hh, ww, cc = x_nhwc.shape
        x2d = x_nhwc.reshape(nn_ * hh, ww * cc)   # contiguous => free lane-dense 2D view
        kernel = functools.partial(_fused_forward_kernel, n=nn_, h=hh, n_pad=self.n_pad)
        args = (x2d, self.mask_top, self.mask_bot, self.m1, self.b1row,
                self.m2, self.b2row, self.wf_pad, self.bf_pad)
        out_pad = pl.pallas_call(
            kernel,
            grid=(1,),   # fits VMEM; at real sizes tile N*H and mark it "parallel" (v7x 2 TCs)
            in_specs=[_full_spec(a.shape) for a in args],
            out_specs=_full_spec((self.n_pad, self.ncls_pad)),
            out_shape=jax.ShapeDtypeStruct((self.n_pad, self.ncls_pad), jnp.float32),
            compiler_params=pltpu.CompilerParams(dimension_semantics=("arbitrary",)),
        )(*args)
        return out_pad[:nn_, :self.ncls]          # (N, num_classes)


class Identity:
    """Pure graph plumbing (named output node); no compute."""

    def __call__(self, x):
        return x


# ----------------------------------------------------------------------------
# Pure-JAX f32 reference (for correctness checking only)
# ----------------------------------------------------------------------------
def reference_forward(x_nhwc, p):
    def conv(x, w_oihw, b):
        w_hwio = jnp.transpose(w_oihw, (2, 3, 1, 0))
        y = jax.lax.conv_general_dilated(
            x, w_hwio, window_strides=(1, 1), padding="SAME",
            dimension_numbers=("NHWC", "HWIO", "NHWC"))
        return y + b.reshape(1, 1, 1, -1)

    h1 = jax.nn.relu(conv(x_nhwc, p["w1"], p["b1"]))
    h2 = jax.nn.relu(conv(h1, p["w2"], p["b2"]))
    h = h2 + h1
    pooled = jnp.mean(h, axis=(1, 2))
    return pooled @ p["wf"].T + p["bf"]


# ----------------------------------------------------------------------------
# Main
# ----------------------------------------------------------------------------
if __name__ == "__main__":
    key = jax.random.PRNGKey(0)
    ks = jax.random.split(key, 8)

    N, Cin, H, W = 2, 4, 16, 16
    Cmid, num_classes = 8, 10

    params = {
        "w1": 0.1 * jax.random.normal(ks[0], (Cmid, Cin, 3, 3), jnp.float32),    # OIHW
        "b1": 0.1 * jax.random.normal(ks[1], (Cmid,), jnp.float32),
        "w2": 0.1 * jax.random.normal(ks[2], (Cmid, Cmid, 3, 3), jnp.float32),   # OIHW
        "b2": 0.1 * jax.random.normal(ks[3], (Cmid,), jnp.float32),
        "wf": 0.1 * jax.random.normal(ks[4], (num_classes, Cmid), jnp.float32),  # (out, in)
        "bf": 0.1 * jax.random.normal(ks[5], (num_classes,), jnp.float32),
    }

    # GraphModule architecture.  Per the performance review the graph's tensor ops are
    # coarsened to a single fused Pallas kernel node (residual/pool/FC all inside it);
    # the graph machinery still resolves paths and routes activations.
    architecture = {
        "input": None,
        "features": {
            "resnet": FusedResConvNet(params["w1"], params["b1"],
                                      params["w2"], params["b2"],
                                      params["wf"], params["bf"],
                                      n=N, h=H, w=W),
        },
        "logits": (Identity(), ["features/resnet"]),
    }

    model = GraphModule(architecture)

    # PyTorch-style NCHW input; convert to NHWC for the TPU kernel (layout glue).
    x_nchw = jax.random.normal(ks[6], (N, Cin, H, W), jnp.float32)
    x_nhwc = jnp.transpose(x_nchw, (0, 2, 3, 1))

    fwd = jax.jit(lambda x: model(x))
    out = jax.block_until_ready(fwd(x_nhwc))            # (N, num_classes)

    ref = jax.block_until_ready(reference_forward(x_nhwc, params))
    assert out.shape == (N, num_classes)
    # bf16 MXU operands (f32 accumulation) => looser tolerance vs the f32 reference.
    assert jnp.allclose(out, ref, rtol=5e-2, atol=5e-2), \
        "Pallas output mismatch vs JAX reference"

    print("KERNEL_OK")
</pallas_src>

<mosaic_0001>
module attributes {stable_mosaic.version = 11 : i64} {
  func.func @_fused_forward_kernel(%arg0: i32, %arg1: memref<32x64xf32, #tpu.memory_space<vmem>>, %arg2: memref<32x1xf32, #tpu.memory_space<vmem>>, %arg3: memref<32x1xf32, #tpu.memory_space<vmem>>, %arg4: memref<192x128xbf16, #tpu.memory_space<vmem>>, %arg5: memref<1x128xf32, #tpu.memory_space<vmem>>, %arg6: memref<384x128xbf16, #tpu.memory_space<vmem>>, %arg7: memref<1x128xf32, #tpu.memory_space<vmem>>, %arg8: memref<128x128xbf16, #tpu.memory_space<vmem>>, %arg9: memref<1x128xf32, #tpu.memory_space<vmem>>, %arg10: memref<8x128xf32, #tpu.memory_space<vmem>>) attributes {dimension_semantics = [#tpu.dimension_semantics<arbitrary>], iteration_bounds = array<i64: 1>, scalar_prefetch = 0 : i64, scratch_operands = 0 : i64, tpu.core_type = #tpu.core_type<tc>, window_params = [{pipeline_mode = #tpu.pipeline_mode<synchronous>, transform_indices = @transform_0, window_bounds = array<i64: 32, 64>}, {pipeline_mode = #tpu.pipeline_mode<synchronous>, transform_indices = @transform_1, window_bounds = array<i64: 32, 1>}, {pipeline_mode = #tpu.pipeline_mode<synchronous>, transform_indices = @transform_2, window_bounds = array<i64: 32, 1>}, {pipeline_mode = #tpu.pipeline_mode<synchronous>, transform_indices = @transform_3, window_bounds = array<i64: 192, 128>}, {pipeline_mode = #tpu.pipeline_mode<synchronous>, transform_indices = @transform_4, window_bounds = array<i64: 1, 128>}, {pipeline_mode = #tpu.pipeline_mode<synchronous>, transform_indices = @transform_5, window_bounds = array<i64: 384, 128>}, {pipeline_mode = #tpu.pipeline_mode<synchronous>, transform_indices = @transform_6, window_bounds = array<i64: 1, 128>}, {pipeline_mode = #tpu.pipeline_mode<synchronous>, transform_indices = @transform_7, window_bounds = array<i64: 128, 128>}, {pipeline_mode = #tpu.pipeline_mode<synchronous>, transform_indices = @transform_8, window_bounds = array<i64: 1, 128>}, {pipeline_mode = #tpu.pipeline_mode<synchronous>, transform_indices = @transform_9, window_bounds = array<i64: 8, 128>}]} {
    %c0 = arith.constant 0 : index
    %c0_0 = arith.constant 0 : index
    %0 = vector.load %arg2[%c0, %c0_0] : memref<32x1xf32, #tpu.memory_space<vmem>>, vector<32x1xf32>
    %c0_1 = arith.constant 0 : index
    %c0_2 = arith.constant 0 : index
    %1 = vector.load %arg3[%c0_1, %c0_2] : memref<32x1xf32, #tpu.memory_space<vmem>>, vector<32x1xf32>
    %c0_3 = arith.constant 0 : index
    %c0_4 = arith.constant 0 : index
    %2 = vector.load %arg1[%c0_3, %c0_4] : memref<32x64xf32, #tpu.memory_space<vmem>>, vector<32x64xf32>
    %c1_i32 = arith.constant 1 : i32
    %3 = tpu.dynamic_rotate %2 by %c1_i32 dim 0 : vector<32x64xf32>, i32 -> vector<32x64xf32>
    %4 = vector.broadcast %0 : vector<32x1xf32> to vector<32x64xf32>
    %5 = arith.mulf %3, %4 : vector<32x64xf32>
    %c31_i32 = arith.constant 31 : i32
    %6 = tpu.dynamic_rotate %2 by %c31_i32 dim 0 : vector<32x64xf32>, i32 -> vector<32x64xf32>
    %7 = vector.broadcast %1 : vector<32x1xf32> to vector<32x64xf32>
    %8 = arith.mulf %6, %7 : vector<32x64xf32>
    %9 = tpu.concatenate %5, %2, %8 in 1 : vector<32x64xf32>, vector<32x64xf32>, vector<32x64xf32> -> vector<32x192xf32>
    %10 = arith.truncf %9 : vector<32x192xf32> to vector<32x192xbf16>
    %c0_5 = arith.constant 0 : index
    %c0_6 = arith.constant 0 : index
    %11 = vector.load %arg4[%c0_5, %c0_6] : memref<192x128xbf16, #tpu.memory_space<vmem>>, vector<192x128xbf16>
    %cst = arith.constant dense<0.000000e+00> : vector<32x128xf32>
    %12 = tpu.matmul %10, %11, %cst {dimension_numbers = #tpu.dot_dimension_numbers<[1], [0], [0], [1], [0, 0, 1, 1], [], []>} : vector<32x192xbf16>, vector<192x128xbf16>, vector<32x128xf32> -> vector<32x128xf32>
    %c0_7 = arith.constant 0 : index
    %c0_8 = arith.constant 0 : index
    %13 = vector.load %arg5[%c0_7, %c0_8] : memref<1x128xf32, #tpu.memory_space<vmem>>, vector<1x128xf32>
    %14 = vector.broadcast %13 : vector<1x128xf32> to vector<32x128xf32>
    %15 = arith.addf %12, %14 : vector<32x128xf32>
    %cst_9 = arith.constant 0.000000e+00 : f32
    %16 = vector.broadcast %cst_9 : f32 to vector<32x128xf32>
    %17 = arith.maximumf %15, %16 : vector<32x128xf32>
    %c1_i32_10 = arith.constant 1 : i32
    %18 = tpu.dynamic_rotate %17 by %c1_i32_10 dim 0 : vector<32x128xf32>, i32 -> vector<32x128xf32>
    %19 = vector.broadcast %0 : vector<32x1xf32> to vector<32x128xf32>
    %20 = arith.mulf %18, %19 : vector<32x128xf32>
    %c31_i32_11 = arith.constant 31 : i32
    %21 = tpu.dynamic_rotate %17 by %c31_i32_11 dim 0 : vector<32x128xf32>, i32 -> vector<32x128xf32>
    %22 = vector.broadcast %1 : vector<32x1xf32> to vector<32x128xf32>
    %23 = arith.mulf %21, %22 : vector<32x128xf32>
    %24 = tpu.concatenate %20, %17, %23 in 1 : vector<32x128xf32>, vector<32x128xf32>, vector<32x128xf32> -> vector<32x384xf32>
    %25 = arith.truncf %24 : vector<32x384xf32> to vector<32x384xbf16>
    %c0_12 = arith.constant 0 : index
    %c0_13 = arith.constant 0 : index
    %26 = vector.load %arg6[%c0_12, %c0_13] : memref<384x128xbf16, #tpu.memory_space<vmem>>, vector<384x128xbf16>
    %cst_14 = arith.constant dense<0.000000e+00> : vector<32x128xf32>
    %27 = tpu.matmul %25, %26, %cst_14 {dimension_numbers = #tpu.dot_dimension_numbers<[1], [0], [0], [1], [0, 0, 1, 1], [], []>} : vector<32x384xbf16>, vector<384x128xbf16>, vector<32x128xf32> -> vector<32x128xf32>
    %c0_15 = arith.constant 0 : index
    %c0_16 = arith.constant 0 : index
    %28 = vector.load %arg7[%c0_15, %c0_16] : memref<1x128xf32, #tpu.memory_space<vmem>>, vector<1x128xf32>
    %29 = vector.broadcast %28 : vector<1x128xf32> to vector<32x128xf32>
    %30 = arith.addf %27, %29 : vector<32x128xf32>
    %cst_17 = arith.constant 0.000000e+00 : f32
    %31 = vector.broadcast %cst_17 : f32 to vector<32x128xf32>
    %32 = arith.maximumf %30, %31 : vector<32x128xf32>
    %33 = arith.addf %32, %17 : vector<32x128xf32>
    %34 = vector.shape_cast %33 : vector<32x128xf32> to vector<2x16x128xf32>
    %cst_18 = arith.constant dense<0.000000e+00> : vector<2x128xf32>
    %35 = vector.multi_reduction <add>, %34, %cst_18 [1] : vector<2x16x128xf32> to vector<2x128xf32>
    %cst_19 = arith.constant 0.000000e+00 : f32
    %36 = vector.broadcast %cst_19 : f32 to vector<6x128xf32>
    %37 = tpu.concatenate %35, %36 in 0 : vector<2x128xf32>, vector<6x128xf32> -> vector<8x128xf32>
    %38 = arith.truncf %37 : vector<8x128xf32> to vector<8x128xbf16>
    %c0_20 = arith.constant 0 : index
    %c0_21 = arith.constant 0 : index
    %39 = vector.load %arg8[%c0_20, %c0_21] : memref<128x128xbf16, #tpu.memory_space<vmem>>, vector<128x128xbf16>
    %cst_22 = arith.constant dense<0.000000e+00> : vector<8x128xf32>
    %40 = tpu.matmul %38, %39, %cst_22 {dimension_numbers = #tpu.dot_dimension_numbers<[1], [0], [0], [1], [0, 0, 1, 1], [], []>} : vector<8x128xbf16>, vector<128x128xbf16>, vector<8x128xf32> -> vector<8x128xf32>
    %c0_23 = arith.constant 0 : index
    %c0_24 = arith.constant 0 : index
    %41 = vector.load %arg9[%c0_23, %c0_24] : memref<1x128xf32, #tpu.memory_space<vmem>>, vector<1x128xf32>
    %42 = vector.broadcast %41 : vector<1x128xf32> to vector<8x128xf32>
    %43 = arith.addf %40, %42 : vector<8x128xf32>
    %c0_25 = arith.constant 0 : index
    %c0_26 = arith.constant 0 : index
    %44 = vector.load %arg10[%c0_25, %c0_26] : memref<8x128xf32, #tpu.memory_space<vmem>>, vector<8x128xf32>
    tpu.vector_store %arg10[%c0_25, %c0_26], %43 {strides = array<i32>} : memref<8x128xf32, #tpu.memory_space<vmem>>, vector<8x128xf32>,
    return
  }
  func.func @transform_0(%arg0: i32) -> (i32, i32) {
    %c0_i32 = arith.constant 0 : i32
    %c0_i32_0 = arith.constant 0 : i32
    %c0_i32_1 = arith.constant 0 : i32
    return %c0_i32, %c0_i32_0 : i32, i32
  }
  func.func @transform_1(%arg0: i32) -> (i32, i32) {
    %c0_i32 = arith.constant 0 : i32
    %c0_i32_0 = arith.constant 0 : i32
    %c0_i32_1 = arith.constant 0 : i32
    return %c0_i32, %c0_i32_0 : i32, i32
  }
  func.func @transform_2(%arg0: i32) -> (i32, i32) {
    %c0_i32 = arith.constant 0 : i32
    %c0_i32_0 = arith.constant 0 : i32
    %c0_i32_1 = arith.constant 0 : i32
    return %c0_i32, %c0_i32_0 : i32, i32
  }
  func.func @transform_3(%arg0: i32) -> (i32, i32) {
    %c0_i32 = arith.constant 0 : i32
    %c0_i32_0 = arith.constant 0 : i32
    %c0_i32_1 = arith.constant 0 : i32
    return %c0_i32, %c0_i32_0 : i32, i32
  }
  func.func @transform_4(%arg0: i32) -> (i32, i32) {
    %c0_i32 = arith.constant 0 : i32
    %c0_i32_0 = arith.constant 0 : i32
    %c0_i32_1 = arith.constant 0 : i32
    return %c0_i32, %c0_i32_0 : i32, i32
  }
  func.func @transform_5(%arg0: i32) -> (i32, i32) {
    %c0_i32 = arith.constant 0 : i32
    %c0_i32_0 = arith.constant 0 : i32
    %c0_i32_1 = arith.constant 0 : i32
    return %c0_i32, %c0_i32_0 : i32, i32
  }
  func.func @transform_6(%arg0: i32) -> (i32, i32) {
    %c0_i32 = arith.constant 0 : i32
    %c0_i32_0 = arith.constant 0 : i32
    %c0_i32_1 = arith.constant 0 : i32
    return %c0_i32, %c0_i32_0 : i32, i32
  }
  func.func @transform_7(%arg0: i32) -> (i32, i32) {
    %c0_i32 = arith.constant 0 : i32
    %c0_i32_0 = arith.constant 0 : i32
    %c0_i32_1 = arith.constant 0 : i32
    return %c0_i32, %c0_i32_0 : i32, i32
  }
  func.func @transform_8(%arg0: i32) -> (i32, i32) {
    %c0_i32 = arith.constant 0 : i32
    %c0_i32_0 = arith.constant 0 : i32
    %c0_i32_1 = arith.constant 0 : i32
    return %c0_i32, %c0_i32_0 : i32, i32
  }
  func.func @transform_9(%arg0: i32) -> (i32, i32) {
    %c0_i32 = arith.constant 0 : i32
    %c0_i32_0 = arith.constant 0 : i32
    %c0_i32_1 = arith.constant 0 : i32
    return %c0_i32, %c0_i32_0 : i32, i32
  }
}

</mosaic_0001>

<bundles_post_ra>
// kernel: _lambda_.1
= control target key start
LH: loop header
LB: loop body
LE: loop exit
PB: predicated region body
PF: predicated region fallthrough
CT: control target
= control target key end

     0   :  { %v928_v0 = vmov 0   ;;  %s929_s17 = smov 64   ;;  %v49_v21 = vlaneseq  ;;  %vm129_vm2 = vcmask 523264   ;;  %vm593_vm3 = vcmask 1041409   ;;  %s1278_s1 = inlined_call_operand.vmem [shape: f32[32,1], index: 1, kind: input, shape index: {}]   ;;  %s1279_s0 = inlined_call_operand.vmem [shape: f32[32,64], index: 0, kind: input, shape index: {}]   ;;  %s1280_s2 = inlined_call_operand.vmem [shape: f32[32,1], index: 2, kind: input, shape index: {}]   ;;  %s1281_s3 = inlined_call_operand.vmem [shape: bf16[192,128], index: 3, kind: input, shape index: {}]   ;;  %s1282_s4 = inlined_call_operand.vmem [shape: f32[1,128], index: 4, kind: input, shape index: {}]   ;;  %s1283_s5 = inlined_call_operand.vmem [shape: bf16[384,128], index: 5, kind: input, shape index: {}]   ;;  %s1284_s6 = inlined_call_operand.vmem [shape: f32[1,128], index: 6, kind: input, shape index: {}]   ;;  %s1285_s8 = inlined_call_operand.vmem [shape: f32[1,128], index: 8, kind: input, shape index: {}]   ;;  %s1286_s7 = inlined_call_operand.vmem [shape: bf16[128,128], index: 7, kind: input, shape index: {}]   ;;  %s1287_s9 = inlined_call_operand.vmem [shape: f32[8,128], index: 9, kind: output, shape index: {}]  }
   0x1   :  { %912 = vset.pattern.permute.xlu0 %v928_v0  ;;  %v33_v1 = vld [vmem:[%s1278_s1] sm:$0xff]  ;;  %v991_v3 = vld [vmem:[%s1279_s0 + $0x8] sm:$0xff]  ;;  %918 = vset.pattern.permute.xlu1 %v928_v0  ;;  %v873_v6 = vld [vmem:[%s1281_s3 + $0x38] sm:$0xff]  ;;  %vm596_vm4 = vcmask 1041408  }
   0x2   :  { %v986_v2 = vld [vmem:[%s1279_s0] sm:$0xff]  ;;  %58 = vperm.xlu0 %912, %v33_v1   ;;  %919 = vset.pattern.permute.xlu2 %v928_v0  ;;  %v38_v5 = vld [vmem:[%s1280_s2 + $0x8] sm:$0xff]  ;;  %v872_v8 = vld [vmem:[%s1281_s3 + $0x30] sm:$0xff]  ;;  %v1052_v24 = vshrl.u32 %v49_v21, 7  ;;  %v46_v26 = vrot.slane %v991_v3, 7  ;;  %v81_v28 = vrot.slane %v991_v3, 1 }
   0x3   :  { %v913_v4 = vpack.i.bf16 %v991_v3, %v986_v2  ;;  %96 = vperm.xlu2 %919, %v38_v5   ;;  %v34_v7 = vld [vmem:[%s1278_s1 + $0x8] sm:$0xff]  ;;  %244 = vmatpush.bf16.msra.mxu0 %v873_v6  ;;  %v37_v9 = vld [vmem:[%s1280_s2] sm:$0xff]  ;;  %v35_v10 = vld [vmem:[%s1278_s1 + $0x10] sm:$0xff]  ;;  %v45_v29 = vrot.slane %v986_v2, 7  ;;  %v80_v30 = vrot.slane %v986_v2, 1 }
   0x4   :  { %v871_v11 = vld [vmem:[%s1281_s3 + $0x28] sm:$0xff]  ;;  %v1019_v12 = vld [vmem:[%s1279_s0 + $0x10] sm:$0xff]  ;;  %v1024_v13 = vld [vmem:[%s1279_s0 + $0x18] sm:$0xff]  ;;  %vm84_vm0 = vcmp.lt.s32.totalorder %v1052_v24, 7  ;;  %vm51_vm1 = vcmp.lt.s32.totalorder %v1052_v24, 1 }
   0x5   :  { %914 = vrot.lane.b32.xlu1 %v913_v4, %s929_s17  ;;  %v36_v14 = vld [vmem:[%s1278_s1 + $0x18] sm:$0xff]  ;;  %v870_v15 = vld [vmem:[%s1281_s3 + $0x20] sm:$0xff]  ;;  %v920_v16 = vpack.i.bf16 %v1024_v13, %v1019_v12  ;;  %v39_v17 = vld [vmem:[%s1280_s2 + $0x10] sm:$0xff]  ;;  %v54_v31 = vsel %vm51_vm1, %v45_v29, %v46_v26  ;;  %v87_v33 = vsel %vm84_vm0, %v80_v30, %v81_v28  ;;  %v82_v39 = vrot.slane %v1019_v12, 1 }
   0x6   :  { %v40_v18 = vld [vmem:[%s1280_s2 + $0x18] sm:$0xff]  ;;  %v868_v22 = vld [vmem:[%s1281_s3 + $0x10] sm:$0xff]  ;;  %v867_v25 = vld [vmem:[%s1281_s3 + $0x8] sm:$0xff]  ;;  %v48_v40 = vrot.slane %v1024_v13, 7  ;;  %v47_v60 = vrot.slane %v1019_v12, 7  ;;  %v83_v0 = vrot.slane %v1024_v13, 1 }
   0x7   :  { %245 = vmatpush.bf16.msra.mxu0 %v872_v8  ;;  %v869_v19 = vld [vmem:[%s1281_s3 + $0x18] sm:$0xff]  ;;  %v876_v23 = vld [vmem:[%s1281_s3 + $0x50] sm:$0xff]  ;;  %v875_v27 = vld [vmem:[%s1281_s3 + $0x48] sm:$0xff]  ;;  %v86_v44 = vsel %vm84_vm0, %v81_v28, %v82_v39 }
   0x8   :  { %v877_v20 = vld [vmem:[%s1281_s3 + $0x58] sm:$0xff]  ;;  %v866_v32 = vld [vmem:[%s1281_s3] sm:$0xff]  ;;  %v892_v38 = vld [vmem:[%s1283_s5 + $0x70] sm:$0xff]  ;;  %v55_v45 = vsel %vm51_vm1, %v48_v40, %v45_v29  ;;  %v53_v63 = vsel %vm51_vm1, %v46_v26, %v47_v60  ;;  %v52_v1 = vsel %vm51_vm1, %v47_v60, %v48_v40  ;;  %v88_v4 = vsel %vm84_vm0, %v83_v0, %v80_v30 }
   0x9   :  { %267 = vmatpush.bf16.msra.mxu1 %v877_v20  ;;  %v874_v34 = vld [vmem:[%s1281_s3 + $0x40] sm:$0xff]  ;;  %v893_v35 = vld [vmem:[%s1283_s5 + $0x78] sm:$0xff]  ;;  %v891_v43 = vld [vmem:[%s1283_s5 + $0x68] sm:$0xff]  ;;  %v85_v8 = vsel %vm84_vm0, %v82_v39, %v83_v0 }
   0xa   :  { %63 = vperm.xlu0 %912, %v34_v7   ;;  %v901_v37 = vld [vmem:[%s1283_s5 + $0xb8] sm:$0xff]  ;;  %531 = vmatpush.bf16.msra.mxu3 %v893_v35  ;;  %v890_v52 = vld [vmem:[%s1283_s5 + $0x60] sm:$0xff]  ;;  %v899_v20 = vld [vmem:[%s1283_s5 + $0xa8] sm:$0xff] }
   0xb   :  { %68 = vperm.xlu2 %919, %v35_v10   ;;  %246 = vmatpush.bf16.msra.mxu0 %v871_v11  ;;  %v887_v21 = vld [vmem:[%s1283_s5 + $0x48] sm:$0xff]  ;;  %v882_v28 = vld [vmem:[%s1283_s5 + $0x20] sm:$0xff]  ;;  %v896_v29 = vld [vmem:[%s1283_s5 + $0x90] sm:$0xff] }
   0xc   :  { %v883_v26 = vld [vmem:[%s1283_s5 + $0x28] sm:$0xff]  ;;  %v881_v30 = vld [vmem:[%s1283_s5 + $0x18] sm:$0xff]  ;;  %v878_v39 = vld [vmem:[%s1283_s5] sm:$0xff] }
   0xd   :  { %91 = vperm.xlu1 %918, %v37_v9   ;;  %268 = vmatpush.bf16.msra.mxu1 %v876_v23  ;;  %v898_v23 = vld [vmem:[%s1283_s5 + $0xa0] sm:$0xff]  ;;  %v907_v24 = vld [vmem:[%s1286_s7 + $0x28] sm:$0xff]  ;;  %vm863_vm5 = vmpackc.low %vm596_vm4, %vm596_vm4 }
   0xe   :  { %532 = vmatpush.bf16.msra.mxu3 %v892_v38 }
   0xf   :  { %247 = vmatpush.bf16.msra.mxu0 %v870_v15 }
  0x11   :  { %269 = vmatpush.bf16.msra.mxu1 %v875_v27  ;;  %v897_v27 = vld [vmem:[%s1283_s5 + $0x98] sm:$0xff] }
  0x12   :  { %73 = vperm.xlu0 %912, %v36_v14   ;;  %533 = vmatpush.bf16.msra.mxu3 %v891_v43 }
  0x13   :  { %101 = vperm.xlu2 %919, %v39_v17   ;;  %248 = vmatpush.bf16.msra.mxu0 %v869_v19  ;;  %v900_v17 = vld [vmem:[%s1283_s5 + $0xb0] sm:$0xff]  ;;  %v885_v19 = vld [vmem:[%s1283_s5 + $0x38] sm:$0xff] }
  0x14   :  { %512 = vmatpush.bf16.msra.mxu2 %v885_v19 }
  0x15   :  { %921 = vrot.lane.b32.xlu1 %v920_v16, %s929_s17  ;;  %270 = vmatpush.bf16.msra.mxu1 %v874_v34  ;;  %v889_v16 = vld [vmem:[%s1283_s5 + $0x58] sm:$0xff]  ;;  %v879_v34 = vld [vmem:[%s1283_s5 + $0x8] sm:$0xff] }
  0x16   :  { %534 = vmatpush.bf16.msra.mxu3 %v890_v52 }
  0x17   :  { %249 = vmatpush.bf16.msra.mxu0 %v868_v22  ;;  %v884_v22 = vld [vmem:[%s1283_s5 + $0x30] sm:$0xff] }
  0x18   :  { %513 = vmatpush.bf16.msra.mxu2 %v884_v22 }
  0x19   :  { %550 = vmatpush.bf16.msrb.mxu1 %v901_v37  ;;  %v925_v37 = vld [vmem:[%s1282_s4] ss:$0 sm:$0xff] }
  0x1a   :  { %106 = vperm.xlu0 %912, %v40_v18   ;;  %535 = vmatpush.bf16.msra.mxu3 %v889_v16  ;;  %v888_v18 = vld [vmem:[%s1283_s5 + $0x50] sm:$0xff] }
  0x1b   :  { %250 = vmatpush.bf16.msra.mxu0 %v867_v25  ;;  %v886_v25 = vld [vmem:[%s1283_s5 + $0x40] sm:$0xff] }
  0x1c   :  { %514 = vmatpush.bf16.msra.mxu2 %v883_v26 }
  0x1d   :  { %551 = vmatpush.bf16.msrb.mxu1 %v900_v17 }
  0x1e   :  { %536 = vmatpush.bf16.msra.mxu3 %v888_v18 }
  0x1f   :  { %251 = vmatpush.bf16.msra.mxu0 %v866_v32  ;;  %v880_v32 = vld [vmem:[%s1283_s5 + $0x10] sm:$0xff] }
  0x20   :  { %515 = vmatpush.bf16.msra.mxu2 %v882_v28 }
  0x21   :  { %552 = vmatpush.bf16.msrb.mxu1 %v899_v20 }
  0x22   :  { %537 = vmatpush.bf16.msra.mxu3 %v887_v21 }
  0x24   :  { %516 = vmatpush.bf16.msra.mxu2 %v881_v30  ;;  %v926_v30 = vld [vmem:[%s1284_s6] ss:$0 sm:$0xff] }
  0x25   :  { %553 = vmatpush.bf16.msrb.mxu1 %v898_v23 }
  0x26   :  { %538 = vmatpush.bf16.msra.mxu3 %v886_v25 }
  0x28   :  { %517 = vmatpush.bf16.msra.mxu2 %v880_v32 }
  0x29   :  { %554 = vmatpush.bf16.msrb.mxu1 %v897_v27 }
  0x2c   :  { %518 = vmatpush.bf16.msra.mxu2 %v879_v34  ;;  %v904_v34 = vld [vmem:[%s1286_s7 + $0x10] sm:$0xff] }
  0x2d   :  { %555 = vmatpush.bf16.msrb.mxu1 %v896_v29 }
  0x30   :  { %519 = vmatpush.bf16.msra.mxu2 %v878_v39 }
  0x5d   :  { %v1089_v42 = vpop.permute.xlu2 %96 }
  0x5e   :  { %v110_v48 = vmul.f32 %v1089_v42, %v86_v44 }
  0x65   :  { %v1111_v59 = vpop.permute.xlu2 %68 }
  0x66   :  { %v78_v5 = vmul.f32 %v1111_v59, %v53_v63 }
  0x6d   :  { %v1126_v7 = vpop.permute.xlu2 %101 }
  0x6e   :  { %v111_v13 = vmul.f32 %v1126_v7, %v85_v8 }
  0x74   :  { %v1079_v36 = vpop.permute.xlu0 %58 }
  0x75   :  { %v76_v49 = vmul.f32 %v1079_v36, %v55_v45 }
  0x77   :  { %v915_v41 = vpop.permute.xlu1 %914 }
  0x78   :  { %v916_v46 = vunpack.i.l.bf16 %v915_v41  ;;  %v917_v50 = vunpack.i.h.bf16 %v915_v41 }
  0x7a   :  { %v130_v55 = vsel %vm129_vm2, %v76_v49, %v916_v46 }
  0x7c   :  { %v1098_v47 = vpop.permute.xlu0 %63 }
  0x7d   :  { %v77_v51 = vmul.f32 %v1098_v47, %v54_v31  ;;  %v895_v31 = vld [vmem:[%s1283_s5 + $0x88] sm:$0xff] }
  0x7e   :  { %556 = vmatpush.bf16.msrb.mxu1 %v895_v31  ;;  %v905_v31 = vld [vmem:[%s1286_s7 + $0x18] sm:$0xff] }
  0x7f   :  { %v1106_v53 = vpop.permute.xlu1 %91  ;;  %v131_v56 = vsel %vm129_vm2, %v77_v51, %v917_v50 }
  0x80   :  { %v109_v54 = vmul.f32 %v1106_v53, %v87_v33  ;;  %v134_v57 = vpack.c.bf16 %v131_v56, %v130_v55  ;;  %v894_v33 = vld [vmem:[%s1283_s5 + $0x80] sm:$0xff] }
  0x82   :  { %v135_v58 = vpack.c.bf16 %v110_v48, %v109_v54  ;;  %252 = vmatmul.bf16.vlgmr.msra.gmra.mxu0 %v134_v57  ;;  %557 = vmatpush.bf16.msrb.mxu1 %v894_v33 }
  0x84   :  { %733 = vmatmul.msk.bf16.vlgmr.msra.gmra.mxu1 %vm129_vm2, %v135_v58  ;;  %v1115_v61 = vpop.permute.xlu0 %73 }
  0x85   :  { %v79_v6 = vmul.f32 %v1115_v61, %v52_v1 }
  0x87   :  { %v922_v62 = vpop.permute.xlu1 %921 }
  0x88   :  { %v924_v2 = vunpack.i.h.bf16 %v922_v62  ;;  %v923_v3 = vunpack.i.l.bf16 %v922_v62 }
  0x8a   :  { %v132_v11 = vsel %vm129_vm2, %v78_v5, %v923_v3  ;;  %v133_v12 = vsel %vm129_vm2, %v79_v6, %v924_v2 }
  0x8b   :  { %v136_v14 = vpack.c.bf16 %v133_v12, %v132_v11 }
  0x8c   :  { %v1130_v9 = vpop.permute.xlu0 %106 }
  0x8d   :  { %v112_v10 = vmul.f32 %v1130_v9, %v88_v4 }
  0x8f   :  { %v137_v15 = vpack.c.bf16 %v112_v10, %v111_v13 }
  0x92   :  { %257 = vmatmul.bf16.gmra.mxu0 %v136_v14 }
  0x94   :  { %734 = vmatmul.msk.bf16.gmra.mxu1 %vm129_vm2, %v137_v15 }
  0xff   :  { %v253_v35 = vpop.f32.mrf.mxu0 }
 0x100   :  { %v254_v40 = vadd.f32 %v925_v37, %v253_v35 }
 0x101   :  { %v272_v38 = vpop.f32.mrf.mxu1 }
 0x102   :  { %v273_v43 = vadd.f32 %v272_v38, %v254_v40 }
 0x104   :  { %v1197_v48 = vmax.f32 %v273_v43, 0.0 }
 0x106   :  { %v298_v57 = vrot.slane %v1197_v48, 1  ;;  %v286_v11 = vrot.slane %v1197_v48, 7 }
 0x107   :  { %v255_v41 = vpop.f32.mrf.mxu0 }
 0x108   :  { %v256_v44 = vadd.f32 %v925_v37, %v255_v41  ;;  %v903_v41 = vld [vmem:[%s1286_s7 + $0x8] sm:$0xff] }
 0x109   :  { %v274_v45 = vpop.f32.mrf.mxu1 }
 0x10a   :  { %v275_v46 = vadd.f32 %v274_v45, %v256_v44  ;;  %v902_v45 = vld [vmem:[%s1286_s7] sm:$0xff] }
 0x10c   :  { %v1199_v49 = vmax.f32 %v275_v46, 0.0 }
 0x10e   :  { %v311_v50 = vpack.c.bf16 %v1199_v49, %v1197_v48  ;;  %v299_v55 = vrot.slane %v1199_v49, 1  ;;  %v287_v6 = vrot.slane %v1199_v49, 7 }
 0x10f   :  { %v258_v51 = vpop.f32.mrf.mxu0 }
 0x110   :  { %v259_v52 = vadd.f32 %v925_v37, %v258_v51  ;;  %539 = vmatmul.bf16.vlgmr.msra.gmra.mxu3 %v311_v50  ;;  %v304_v62 = vsel %vm84_vm0, %v298_v57, %v299_v55  ;;  %v292_v14 = vsel %vm51_vm1, %v286_v11, %v287_v6 }
 0x111   :  { %v277_v54 = vpop.f32.mrf.mxu1  ;;  %v306_v3 = vmul.f32 %v304_v62, %v1106_v53  ;;  %v295_v16 = vmul.f32 %v292_v14, %v1098_v47 }
 0x112   :  { %v278_v56 = vadd.f32 %v277_v54, %v259_v52 }
 0x114   :  { %v1205_v58 = vmax.f32 %v278_v56, 0.0 }
 0x116   :  { %v300_v60 = vrot.slane %v1205_v58, 1  ;;  %v288_v22 = vrot.slane %v1205_v58, 7 }
 0x117   :  { %v260_v63 = vpop.f32.mrf.mxu0 }
 0x118   :  { %v261_v0 = vadd.f32 %v925_v37, %v260_v63  ;;  %v303_v2 = vsel %vm84_vm0, %v299_v55, %v300_v60  ;;  %v291_v47 = vsel %vm51_vm1, %v287_v6, %v288_v22 }
 0x119   :  { %v279_v1 = vpop.f32.mrf.mxu1  ;;  %v307_v4 = vmul.f32 %v303_v2, %v1089_v42  ;;  %v296_v26 = vmul.f32 %v291_v47, %v1111_v59  ;;  %v906_v59 = vld [vmem:[%s1286_s7 + $0x20] sm:$0xff] }
 0x11a   :  { %v280_v5 = vadd.f32 %v279_v1, %v261_v0 }
 0x11b   :  { %v312_v8 = vpack.c.bf16 %v307_v4, %v306_v3 }
 0x11c   :  { %v1215_v10 = vmax.f32 %v280_v5, 0.0 }
 0x11d   :  { %558 = vmatmul.bf16.vlgmr.msrb.gmra.mxu1 %v312_v8 }
 0x11e   :  { %v314_v12 = vpack.c.bf16 %v1215_v10, %v1205_v58  ;;  %v289_v13 = vrot.slane %v1215_v10, 7  ;;  %v301_v53 = vrot.slane %v1215_v10, 1 }
 0x120   :  { %544 = vmatmul.bf16.gmra.mxu3 %v314_v12  ;;  %v293_v42 = vsel %vm51_vm1, %v289_v13, %v286_v11  ;;  %v302_v18 = vsel %vm84_vm0, %v300_v60, %v301_v53  ;;  %v305_v19 = vsel %vm84_vm0, %v301_v53, %v298_v57 }
 0x121   :  { %v294_v15 = vmul.f32 %v293_v42, %v1079_v36  ;;  %v308_v20 = vmul.f32 %v302_v18, %v1126_v7  ;;  %v309_v21 = vmul.f32 %v305_v19, %v1130_v9  ;;  %v290_v36 = vsel %vm51_vm1, %v288_v22, %v289_v13  ;;  %v909_v7 = vld [vmem:[%s1286_s7 + $0x38] sm:$0xff]  ;;  %v908_v9 = vld [vmem:[%s1286_s7 + $0x30] sm:$0xff] }
 0x122   :  { %v297_v25 = vmul.f32 %v290_v36, %v1115_v61  ;;  %667 = vmatpush.bf16.msrb.mxu0 %v909_v7 }
 0x123   :  { %v310_v17 = vpack.c.bf16 %v295_v16, %v294_v15  ;;  %v315_v23 = vpack.c.bf16 %v309_v21, %v308_v20 }
 0x124   :  { %v313_v27 = vpack.c.bf16 %v297_v25, %v296_v26 }
 0x125   :  { %520 = vmatmul.bf16.vlgmr.msra.gmra.mxu2 %v310_v17 }
 0x126   :  { %668 = vmatpush.bf16.msrb.mxu0 %v908_v9 }
 0x12a   :  { %669 = vmatpush.bf16.msrb.mxu0 %v907_v24 }
 0x12d   :  { %563 = vmatmul.bf16.gmra.mxu1 %v315_v23 }
 0x12e   :  { %670 = vmatpush.bf16.msrb.mxu0 %v906_v59 }
 0x132   :  { %671 = vmatpush.bf16.msrb.mxu0 %v905_v31 }
 0x135   :  { %525 = vmatmul.bf16.gmra.mxu2 %v313_v27 }
 0x136   :  { %672 = vmatpush.bf16.msrb.mxu0 %v904_v34 }
 0x13a   :  { %673 = vmatpush.bf16.msrb.mxu0 %v903_v41 }
 0x13e   :  { %674 = vmatpush.bf16.msrb.mxu0 %v902_v45 }
 0x193   :  { %v540_v28 = vpop.f32.mrf.mxu3 }
 0x19a   :  { %v559_v61 = vpop.f32.mrf.mxu1 }
 0x19b   :  { %v542_v33 = vpop.f32.mrf.mxu3 }
 0x1a2   :  { %v561_v35 = vpop.f32.mrf.mxu1 }
 0x1a3   :  { %v545_v50 = vpop.f32.mrf.mxu3 }
 0x1a8   :  { %v521_v29 = vpop.f32.mrf.mxu2 }
 0x1a9   :  { %v522_v32 = vadd.f32 %v926_v30, %v521_v29 }
 0x1aa   :  { %v564_v55 = vpop.f32.mrf.mxu1 }
 0x1ab   :  { %v541_v38 = vadd.f32 %v540_v28, %v522_v32  ;;  %v547_v2 = vpop.f32.mrf.mxu3 }
 0x1ad   :  { %v560_v43 = vadd.f32 %v559_v61, %v541_v38 }
 0x1af   :  { %v569_v52 = vmax.f32 %v560_v43, 0.0 }
 0x1b0   :  { %v523_v37 = vpop.f32.mrf.mxu2 }
 0x1b1   :  { %v524_v39 = vadd.f32 %v926_v30, %v523_v37  ;;  %v573_v57 = vadd.f32 %v569_v52, %v1197_v48 }
 0x1b2   :  { %v566_v5 = vpop.f32.mrf.mxu1 }
 0x1b3   :  { %v543_v40 = vadd.f32 %v542_v33, %v524_v39 }
 0x1b5   :  { %v562_v44 = vadd.f32 %v561_v35, %v543_v40 }
 0x1b7   :  { %v570_v46 = vmax.f32 %v562_v44, 0.0 }
 0x1b8   :  { %v526_v51 = vpop.f32.mrf.mxu2 }
 0x1b9   :  { %v527_v54 = vadd.f32 %v926_v30, %v526_v51  ;;  %v574_v56 = vadd.f32 %v570_v46, %v1199_v49 }
 0x1bb   :  { %v546_v60 = vadd.f32 %v545_v50, %v527_v54  ;;  %v577_v62 = vadd.f32 %v574_v56, %v573_v57 }
 0x1bd   :  { %v565_v0 = vadd.f32 %v564_v55, %v546_v60  ;;  %v578_v3 = vrot.slane %v577_v62, 4 }
 0x1bf   :  { %v571_v6 = vmax.f32 %v565_v0, 0.0  ;;  %v579_v11 = vadd.f32 %v578_v3, %v577_v62 }
 0x1c0   :  { %v528_v63 = vpop.f32.mrf.mxu2 }
 0x1c1   :  { %v529_v1 = vadd.f32 %v926_v30, %v528_v63  ;;  %v575_v13 = vadd.f32 %v571_v6, %v1205_v58  ;;  %v580_v49 = vrot.slane %v579_v11, 2  ;;  %v927_v58 = vld [vmem:[%s1285_s8] ss:$0 sm:$0xff] }
 0x1c3   :  { %v548_v4 = vadd.f32 %v547_v2, %v529_v1  ;;  %v581_v53 = vadd.f32 %v580_v49, %v579_v11 }
 0x1c5   :  { %v567_v8 = vadd.f32 %v566_v5, %v548_v4  ;;  %v582_v18 = vrot.slane %v581_v53, 1 }
 0x1c7   :  { %v572_v12 = vmax.f32 %v567_v8, 0.0  ;;  %v583_v20 = vadd.f32 %v582_v18, %v581_v53 }
 0x1c9   :  { %v576_v14 = vadd.f32 %v572_v12, %v1215_v10 }
 0x1cb   :  { %v584_v42 = vadd.f32 %v576_v14, %v575_v13 }
 0x1cd   :  { %v585_v48 = vrot.slane %v584_v42, 4 }
 0x1cf   :  { %v586_v15 = vadd.f32 %v585_v48, %v584_v42 }
 0x1d1   :  { %v587_v16 = vrot.slane %v586_v15, 2 }
 0x1d3   :  { %v588_v17 = vadd.f32 %v587_v16, %v586_v15 }
 0x1d5   :  { %v589_v19 = vrot.slane %v588_v17, 1 }
 0x1d7   :  { %v590_v21 = vadd.f32 %v589_v19, %v588_v17 }
 0x1d9   :  { %v594_v22 = vsel %vm593_vm3, %v590_v21, %v583_v20 }
 0x1da   :  { %v864_v23 = vpack.c.bf16 %v594_v22, %v594_v22 }
 0x1dc   :  { %865 = vmatmul.msk.bf16.vlgmr.msrb.gmra.mxu0 %vm863_vm5, %v864_v23 }
 0x259   :  { %v676_v10 = vpop.f32.mrf.mxu0 }
 0x25a   :  { %v677_v36 = vadd.f32 %v927_v58, %v676_v10 }
 0x25c   :  { %680 = vst [vmem:[%s1287_s9] sm:$0xff] %v677_v36 }
 0x261   :  { %v678_v47 = vpop.f32.mrf.mxu0 }

</bundles_post_ra>
